<compile_context>
chip_gen: v5e
topology: v5e:2x2
jax: 0.10.0
libtpu: 0.0.40
codegen_flags: <defaults>
</compile_context>

<pallas_src>
import jax
import jax.numpy as jnp
from jax.experimental import pallas as pl
from jax.experimental.pallas import tpu as pltpu


def _linear_kernel(x_ref, w_ref, b_ref, o_ref):
    # x_ref: (TB, F) VMEM, w_ref: (F, 1) VMEM, b_ref: (1, 1) SMEM, o_ref: (TB, 1)
    acc = jnp.dot(x_ref[...], w_ref[...], preferred_element_type=jnp.float32)
    o_ref[...] = (acc + b_ref[0, 0]).astype(o_ref.dtype)


def _round_up(v, m):
    return ((v + m - 1) // m) * m


def _vmem_capacity_bytes():
    """Physical VMEM of this generation; conservative fallback if unknown."""
    try:
        cap = int(getattr(pltpu.get_tpu_info(), "vmem_capacity_bytes", 0))
        if cap > 0:
            return cap
    except Exception:
        pass
    return 64 << 20  # v7x per-TensorCore size — safe lower bound everywhere


def _vmem_row_cap(F, budget_bytes):
    """Max batch-tile rows so that double-buffered (lane-padded) x + out tiles
    plus the resident weight fit in `budget_bytes`."""
    rF = _round_up(max(F, 1), 128)            # x block padded to >=128 lanes
    per_row = 2 * 4 * (rF + 128)              # 2 buffers x (x row + padded out row)
    w_bytes = _round_up(max(F, 1), 8) * 128 * 4
    avail = max(budget_bytes - w_bytes - (2 << 20), per_row * 8)
    return max(8, (avail // per_row) // 8 * 8)


def linear_forward(x, w, b, *, block_rows=None):
    """y = x @ w + b where x:(B, F), w:(F, 1), b:(1, 1) -> (B, 1)."""
    B_in, F = x.shape
    assert w.shape == (F, 1)

    # Tiny-batch path only: pad up to one sublane tile (<= 7 extra rows).
    B = B_in
    if B < 8:
        x = jnp.pad(x, ((0, 8 - B), (0, 0)))
        B = 8

    capacity = _vmem_capacity_bytes()
    # Per-generation tile budget: ~100 MiB on 128 MiB chips, ~48 MiB on v7x.
    budget = max(min(capacity - (16 << 20), 100 << 20), 8 << 20)

    row_cap = _vmem_row_cap(F, budget)        # VMEM-derived cap (no 1024 limit)
    batch_cap = max(8, (B // 8) * 8)          # never exceed the batch itself

    if block_rows is None:
        TB = min(row_cap, batch_cap)
        if B >= 16:
            # Keep >= 2 tiles: 2-TC sharding on v7x + double-buffered DMA overlap.
            TB = min(TB, max(8, _round_up((B + 1) // 2, 8)))
    else:
        TB = min(max(8, (block_rows // 8) * 8), row_cap, batch_cap)

    num_tiles = (B + TB - 1) // TB            # ragged last tile handled by Pallas

    # VMEM limit with lane padding accounted for, clamped under physical VMEM.
    rF = _round_up(F, 128)
    vmem_needed = (2 * (TB * rF * 4 + TB * 128 * 4)
                   + _round_up(F, 8) * 128 * 4 + (2 << 20))
    vmem_bytes = int(min(max(vmem_needed, 16 << 20), capacity - (8 << 20)))

    out = pl.pallas_call(
        _linear_kernel,
        out_shape=jax.ShapeDtypeStruct((B, 1), jnp.float32),
        grid_spec=pltpu.PrefetchScalarGridSpec(
            num_scalar_prefetch=0,
            grid=(num_tiles,),
            in_specs=[
                pl.BlockSpec((TB, F), lambda i: (i, 0)),   # batch-tiled x
                pl.BlockSpec((F, 1), lambda i: (0, 0)),    # weight, VMEM-resident
                pl.BlockSpec(memory_space=pltpu.SMEM),     # scalar bias
            ],
            out_specs=pl.BlockSpec((TB, 1), lambda i: (i, 0)),
        ),
        compiler_params=pltpu.CompilerParams(
            dimension_semantics=("parallel",),
            vmem_limit_bytes=vmem_bytes,
        ),
        cost_estimate=pl.CostEstimate(
            flops=2 * B_in * F,
            bytes_accessed=4 * (B_in * F + F + B_in),
            transcendentals=0,
        ),
    )(x, w, b)

    return out[:B_in]


class LinearNetPallas:
    """Mirror of the PyTorch LinearNet: single nn.Linear(num_feature, 1)."""

    def __init__(self, num_feature, key):
        kw, kb = jax.random.split(key)
        bound = 1.0 / jnp.sqrt(jnp.float32(num_feature))
        # PyTorch weight is (1, F); store its transpose (F, 1) for the kernel.
        self.w = jax.random.uniform(
            kw, (num_feature, 1), jnp.float32, -bound, bound
        )
        self.b = jax.random.uniform(kb, (1, 1), jnp.float32, -bound, bound)

    def __call__(self, x, **kw):
        return linear_forward(x, self.w, self.b, **kw)


if __name__ == "__main__":
    key = jax.random.PRNGKey(0)
    k_x, k_params = jax.random.split(key)

    batch, num_feature = 20, 8
    x = jax.random.normal(k_x, (batch, num_feature), jnp.float32)

    model = LinearNetPallas(num_feature, k_params)
    y_ref = x @ model.w + model.b[0, 0]

    # Forced small tiles: 3 grid steps, ragged (masked-write) last tile.
    y1 = jax.block_until_ready(model(x, block_rows=8))
    assert y1.shape == (batch, 1)
    assert jnp.allclose(y1, y_ref, atol=1e-5, rtol=1e-5)

    # Auto-tiled path (>= 2 tiles for megacore sharding / DMA overlap).
    y2 = jax.block_until_ready(model(x))
    assert jnp.allclose(y2, y_ref, atol=1e-5, rtol=1e-5)

    # Tiny-batch path (B < 8 -> padded to one sublane tile internally).
    x_small = x[:5]
    y3 = jax.block_until_ready(model(x_small))
    assert y3.shape == (5, 1)
    assert jnp.allclose(y3, x_small @ model.w + model.b[0, 0], atol=1e-5, rtol=1e-5)

    print("KERNEL_OK")
</pallas_src>

<mosaic_0001>
module attributes {stable_mosaic.version = 11 : i64} {
  func.func @_linear_kernel(%arg0: i32, %arg1: memref<8x8xf32, #tpu.memory_space<vmem>>, %arg2: memref<8x1xf32, #tpu.memory_space<vmem>>, %arg3: memref<1x1xf32, #tpu.memory_space<smem>>, %arg4: memref<8x1xf32, #tpu.memory_space<vmem>>) attributes {dimension_semantics = [#tpu.dimension_semantics<parallel>], iteration_bounds = array<i64: 3>, scalar_prefetch = 0 : i64, scratch_operands = 0 : i64, tpu.core_type = #tpu.core_type<tc>, window_params = [{transform_indices = @transform_0, window_bounds = array<i64: 8, 8>}, {pipeline_mode = #tpu.pipeline_mode<synchronous>, transform_indices = @transform_1, window_bounds = array<i64: 8, 1>}, {transform_indices = @transform_2, window_bounds = array<i64: 1, 1>}, {transform_indices = @transform_3, window_bounds = array<i64: 8, 1>}]} {
    %c0 = arith.constant 0 : index
    %c0_0 = arith.constant 0 : index
    %0 = vector.load %arg1[%c0, %c0_0] : memref<8x8xf32, #tpu.memory_space<vmem>>, vector<8x8xf32>
    %c0_1 = arith.constant 0 : index
    %c0_2 = arith.constant 0 : index
    %1 = vector.load %arg2[%c0_1, %c0_2] : memref<8x1xf32, #tpu.memory_space<vmem>>, vector<8x1xf32>
    %cst = arith.constant dense<0.000000e+00> : vector<8x1xf32>
    %2 = tpu.matmul %0, %1, %cst {dimension_numbers = #tpu.dot_dimension_numbers<[1], [0], [0], [1], [0, 0, 1, 1], [], []>} : vector<8x8xf32>, vector<8x1xf32>, vector<8x1xf32> -> vector<8x1xf32>
    %c0_3 = arith.constant 0 : index
    %c0_4 = arith.constant 0 : index
    %3 = memref.load %arg3[%c0_3, %c0_4] : memref<1x1xf32, #tpu.memory_space<smem>>
    %4 = vector.broadcast %3 : f32 to vector<8x1xf32>
    %5 = arith.addf %2, %4 : vector<8x1xf32>
    %c0_5 = arith.constant 0 : index
    %c0_6 = arith.constant 0 : index
    %6 = vector.load %arg4[%c0_5, %c0_6] : memref<8x1xf32, #tpu.memory_space<vmem>>, vector<8x1xf32>
    tpu.vector_store %arg4[%c0_5, %c0_6], %5 {strides = array<i32>} : memref<8x1xf32, #tpu.memory_space<vmem>>, vector<8x1xf32>,
    return
  }
  func.func @transform_0(%arg0: i32) -> (i32, i32) {
    %c0_i32 = arith.constant 0 : i32
    %c0_i32_0 = arith.constant 0 : i32
    return %arg0, %c0_i32 : i32, i32
  }
  func.func @transform_1(%arg0: i32) -> (i32, i32) {
    %c0_i32 = arith.constant 0 : i32
    %c0_i32_0 = arith.constant 0 : i32
    %c0_i32_1 = arith.constant 0 : i32
    return %c0_i32, %c0_i32_0 : i32, i32
  }
  func.func @transform_2(%arg0: i32) -> (i32, i32) {
    %c0_i32 = arith.constant 0 : i32
    %c0_i32_0 = arith.constant 0 : i32
    %c0_i32_1 = arith.constant 0 : i32
    return %c0_i32, %c0_i32_0 : i32, i32
  }
  func.func @transform_3(%arg0: i32) -> (i32, i32) {
    %c0_i32 = arith.constant 0 : i32
    %c0_i32_0 = arith.constant 0 : i32
    return %arg0, %c0_i32 : i32, i32
  }
}

</mosaic_0001>

<bundles_post_ra>
// kernel: tpu_custom_call.1
= control target key start
LH: loop header
LB: loop body
LE: loop exit
PB: predicated region body
PF: predicated region fallthrough
CT: control target
= control target key end

     0   :  { %s272_s14 = smov 0   ;;  %s308_s0 = inlined_call_operand.vmem [shape: f32[20,8], index: 0, kind: input, shape index: {}]   ;;  %s309_s1 = inlined_call_operand.vmem [shape: f32[8,1], index: 1, kind: input, shape index: {}]   ;;  %s310_s2 = inlined_call_operand.<no memory space> [shape: f32[1,1], index: 2, kind: input, shape index: {}]   ;;  %s311_s3 = inlined_call_operand.vmem [shape: f32[20,1], index: 3, kind: output, shape index: {}]  }
   0x1   :  { %8 = sst [smem:[#allocation2]] %s310_s2 }
   0x2 LB: > { %s250_s15 = sadd.s32 4294967295, %s274_s14   ;;  %p254_p0 = scmp.ge.s32.totalorder %s274_s14, 1  ;;  %s274_s14 = sphi %s272_s14, %s14_s14  }
   0x3   : > { %p137_p1 = scmp.lt.s32.totalorder %s274_s14, 4 }
   0x5   : > { %p138_p2 = pnand %p254_p0, %p137_p1 }
   0x6   : > { %p159_p3 = scmp.lt.s32.totalorder (!%p138_p2), %s250_s15, 2  ;;  %s169_s21 = sld [smem:[#allocation2]] (!%p138_p2) }
   0x7   : > { %141 = sbr.rel (%p138_p2) target bundleno = 145 (0x91), region = 32 }
   0xc   : > { %v168_v0 = vld [vmem:[%s309_s1] sm:$0xff]  ;;  %s313_s15 = smov (!%p159_p3, %s250_s15), 2  ;;  %vm171_vm0 = vcmask 64512   ;;  %v170_v2 = vstv %s169_s21  ;;  %vm195_vm1 = vcmask 7168  }
   0xd   : > { %190 = vmatpush.msra.mxu0 %v168_v0  ;;  %s255_s18 = sshll.u32 %s313_s15, 3 }
   0xe   : > { %s162_s20 = scalar_lea.vmem %s308_s0, %s255_s18  ;;  %s166_s24 = scalar_lea.vmem %s311_s3, %s255_s18 }
   0xf   : > { %v167_v1 = vld [vmem:[%s162_s20] sm:$0xff] }
  0x10   : > { %257 = vmatmul.msk.f32.vlgmr.msra.gmra.mxu0 %vm171_vm0, %v167_v1 }
  0x8d   : > { %v192_v3 = vpop.f32.mrf.mxu0 }
  0x8e   : > { %v193_v4 = vadd.f32 %v192_v3, %v170_v2 }
  0x90   : > { %196 = vst.msk [vmem:[%s166_s24] sm:$0xff] %vm195_vm1, %v193_v4 }
  0x91 PF: > { %s14_s14 = sadd.s32 1, %s274_s14  }
  0x92   : > { %p11_p4 = scmp.ge.s32.totalorder %s14_s14, 5  }
  0x94   :  { %13 = sbr.rel (!%p11_p4) target bundleno = 2 (0x2), region = 62 }

</bundles_post_ra>
